<compile_context>
chip_gen: v7x
topology: tpu7x:2x2x1
jax: 0.10.0
libtpu: 0.0.40
codegen_flags: <defaults>
</compile_context>

<pallas_src>
import functools
import numpy as np

import jax
import jax.numpy as jnp
from jax import lax
from jax.experimental import pallas as pl
from jax.experimental.pallas import tpu as pltpu


_NONLIN = {
    None: lambda x: x,
    "relu": lambda x: jnp.maximum(x, 0.0),
    "exp": jnp.exp,
    "softplus": jax.nn.softplus,
    "sigmoid": jax.nn.sigmoid,
}

_VALID_POOLS = (None, "mean", "max", "min", "sum")

# VMEM budget: 48 MiB fits under v7x's 64 MiB physical VMEM per TensorCore and
# is far below v5e/v6e's 128 MiB (it also overrides v5e's 16 MiB scoped default).
_VMEM_LIMIT_BYTES = 48 << 20
_IN_TILE_BYTES = 12 << 20       # per input buffer (double-buffered -> ~24 MiB)
_CHUNK_BYTES = 2 << 20          # in-kernel reduce chunk: bounds f32/mask temps
_ELTWISE_TILE_BYTES = 6 << 20   # elementwise path: in + out, both double-buffered


# ---------------------------------------------------------------------------
# Helpers
# ---------------------------------------------------------------------------
def _parallel_tile(extent, cap, quantum):
    """Tile size for a non-reduced axis: a multiple of `quantum`, or full extent."""
    if extent <= quantum:
        return extent                      # full extent (allowed by (8,128) rule)
    t = min(extent, cap)
    return max(quantum, (t // quantum) * quantum)


def _identity(pool_type):
    """Identity element of the reduction (used to init the acc and mask tails)."""
    if pool_type in ("sum", "mean"):
        return 0.0
    return float("-inf") if pool_type == "max" else float("inf")


def _combine(pool_type, a, b):
    if pool_type in ("sum", "mean"):
        return a + b
    if pool_type == "max":
        return jnp.maximum(a, b)
    return jnp.minimum(a, b)


def _reduce(pool_type, x, axis, keepdims=False):
    if pool_type in ("sum", "mean"):
        return jnp.sum(x, axis=axis, keepdims=keepdims)
    if pool_type == "max":
        return jnp.max(x, axis=axis, keepdims=keepdims)
    return jnp.min(x, axis=axis, keepdims=keepdims)


# ---------------------------------------------------------------------------
# Kernels
# ---------------------------------------------------------------------------
def _pool3d_kernel(x_ref, o_ref, acc_ref, *, pool_type, nonlinearity,
                   s_total, ts, sc, mask_tail):
    """Reduce axis 1 (the S tile) of a (tp, ts, td) block into a (tp, td) f32 acc.

    The S extent of the tile is processed in chunks of `sc` sublanes so the
    f32-upcast / mask temporaries stay ~_CHUNK_BYTES even with 12 MiB tiles.
    The S tail (when ts does not divide S) is masked in-kernel with the pooling
    identity -- no wrapper-side padding, no extra HBM round trip.
    """
    k = pl.program_id(2)
    ident = _identity(pool_type)

    @pl.when(k == 0)
    def _init():
        acc_ref[...] = jnp.full_like(acc_ref, ident)

    if mask_tail:
        valid = s_total - k * ts   # >= ts for every tile but the last one

    for c0 in range(0, ts, sc):
        w = min(sc, ts - c0)
        xs = x_ref[:, c0:c0 + w, :].astype(jnp.float32)
        if mask_tail:
            pos = lax.broadcasted_iota(jnp.int32, (1, w, 1), 1) + c0
            xs = jnp.where(pos < valid, xs, ident)
        acc_ref[...] = _combine(pool_type, acc_ref[...],
                                _reduce(pool_type, xs, axis=1))

    @pl.when(k == pl.num_programs(2) - 1)
    def _finalize():
        r = acc_ref[...]
        if pool_type == "mean":
            r = r * (1.0 / float(s_total))
        r = _NONLIN[nonlinearity](r)
        o_ref[...] = r.astype(o_ref.dtype)


def _pool2d_kernel(x_ref, o_ref, acc_ref, *, pool_type, nonlinearity,
                   s_total, ts, cs, mask_tail):
    """D == 1 path: reduce the lane axis of a lane-dense (tp, ts) block into a
    (tp, 1) f32 accumulator, chunking the lane axis by `cs` lanes.  Each chunk's
    cross-lane reduce is independent; only the tiny (tp, 1) combine carries."""
    k = pl.program_id(1)
    ident = _identity(pool_type)

    @pl.when(k == 0)
    def _init():
        acc_ref[...] = jnp.full_like(acc_ref, ident)

    if mask_tail:
        valid = s_total - k * ts

    part = acc_ref[...]
    for c0 in range(0, ts, cs):
        w = min(cs, ts - c0)
        xs = x_ref[:, c0:c0 + w].astype(jnp.float32)
        if mask_tail:
            pos = lax.broadcasted_iota(jnp.int32, (1, w), 1) + c0
            xs = jnp.where(pos < valid, xs, ident)
        part = _combine(pool_type, part,
                        _reduce(pool_type, xs, axis=1, keepdims=True))
    acc_ref[...] = part

    @pl.when(k == pl.num_programs(1) - 1)
    def _finalize():
        r = acc_ref[...]
        if pool_type == "mean":
            r = r * (1.0 / float(s_total))
        r = _NONLIN[nonlinearity](r)
        o_ref[...] = r.astype(o_ref.dtype)


def _elementwise_kernel(x_ref, o_ref, *, nonlinearity):
    """pool_type=None path: apply the nonlinearity elementwise."""
    r = _NONLIN[nonlinearity](x_ref[...].astype(jnp.float32))
    o_ref[...] = r.astype(o_ref.dtype)


# ---------------------------------------------------------------------------
# Wrappers
# ---------------------------------------------------------------------------
def _pool3d(x3, pool_type, nonlinearity, in_tile_bytes):
    """Pool the middle axis of a (P, S, D) tensor -> (P, D)."""
    P, S, D = x3.shape
    itemsize = jnp.dtype(x3.dtype).itemsize

    # Lane tile: prefer the FULL D extent (contiguous HBM runs, lane-dense
    # unmasked output stores); cap at 2048 lanes for very large D.
    td = D if D <= 2048 else _parallel_tile(D, 2048, 128)
    tp = _parallel_tile(P, 256, 8)
    # Shrink tp if even the minimum 8-row S tile would blow the byte budget.
    while tp > 8 and tp * td * itemsize * 8 > in_tile_bytes:
        tp = max(8, ((tp // 2) // 8) * 8)

    per_s_row = max(1, tp * td * itemsize)
    cap_ts = max(8, ((in_tile_bytes // per_s_row) // 8) * 8)
    ts = S if S <= cap_ts else cap_ts
    mask_tail = (S % ts) != 0
    sc = min(ts, max(8, ((_CHUNK_BYTES // per_s_row) // 8) * 8))

    grid = (pl.cdiv(P, tp), pl.cdiv(D, td), pl.cdiv(S, ts))
    kernel = functools.partial(
        _pool3d_kernel, pool_type=pool_type, nonlinearity=nonlinearity,
        s_total=S, ts=ts, sc=sc, mask_tail=mask_tail)

    return pl.pallas_call(
        kernel,
        out_shape=jax.ShapeDtypeStruct((P, D), x3.dtype),
        grid=grid,
        in_specs=[pl.BlockSpec((tp, ts, td), lambda i, j, k: (i, k, j))],
        out_specs=pl.BlockSpec((tp, td), lambda i, j, k: (i, j)),
        scratch_shapes=[pltpu.VMEM((tp, td), jnp.float32)],
        compiler_params=pltpu.CompilerParams(
            dimension_semantics=("parallel", "parallel", "arbitrary"),
            vmem_limit_bytes=_VMEM_LIMIT_BYTES),
    )(x3)


def _pool2d(x2, pool_type, nonlinearity, in_tile_bytes):
    """Pool the last axis of a lane-dense (P, S) tensor -> (P, 1).

    Used when D == 1 so the big input reads use full 128-lane width instead of
    a lane-width-1 layout.
    """
    P, S = x2.shape
    itemsize = jnp.dtype(x2.dtype).itemsize

    tp = _parallel_tile(P, 512, 8)
    per_row = max(1, tp * itemsize)
    cap_ts = max(128, ((in_tile_bytes // per_row) // 128) * 128)
    ts = S if S <= cap_ts else cap_ts
    mask_tail = (S % ts) != 0
    cs = min(ts, max(128, ((_CHUNK_BYTES // per_row) // 128) * 128))

    grid = (pl.cdiv(P, tp), pl.cdiv(S, ts))
    kernel = functools.partial(
        _pool2d_kernel, pool_type=pool_type, nonlinearity=nonlinearity,
        s_total=S, ts=ts, cs=cs, mask_tail=mask_tail)

    return pl.pallas_call(
        kernel,
        out_shape=jax.ShapeDtypeStruct((P, 1), x2.dtype),
        grid=grid,
        in_specs=[pl.BlockSpec((tp, ts), lambda i, k: (i, k))],
        out_specs=pl.BlockSpec((tp, 1), lambda i, k: (i, 0)),
        scratch_shapes=[pltpu.VMEM((tp, 1), jnp.float32)],
        compiler_params=pltpu.CompilerParams(
            dimension_semantics=("parallel", "arbitrary"),
            vmem_limit_bytes=_VMEM_LIMIT_BYTES),
    )(x2)


def _elementwise(x, nonlinearity):
    """pool_type=None path, tiled + lane-dense."""
    orig_shape = x.shape
    n = int(x.size)
    if n == 0:
        return x

    # Re-layout to a lane-dense 2-D view when possible (pointwise op -> free).
    width = None
    for w in (2048, 1024, 512, 256, 128):
        if n % w == 0:
            width = w
            break
    if width is not None:
        x2 = x.reshape(n // width, width)
    else:
        last = orig_shape[-1] if x.ndim >= 1 else 1
        x2 = x.reshape(n // max(1, last), max(1, last))

    R, C = x2.shape
    itemsize = jnp.dtype(x.dtype).itemsize
    tc = _parallel_tile(C, 2048, 128)
    cap_r = max(8, ((_ELTWISE_TILE_BYTES // max(1, tc * itemsize)) // 8) * 8)
    tr = _parallel_tile(R, cap_r, 8)

    grid = (pl.cdiv(R, tr), pl.cdiv(C, tc))
    kernel = functools.partial(_elementwise_kernel, nonlinearity=nonlinearity)
    out = pl.pallas_call(
        kernel,
        out_shape=jax.ShapeDtypeStruct((R, C), x.dtype),
        grid=grid,
        in_specs=[pl.BlockSpec((tr, tc), lambda i, j: (i, j))],
        out_specs=pl.BlockSpec((tr, tc), lambda i, j: (i, j)),
        compiler_params=pltpu.CompilerParams(
            dimension_semantics=("parallel", "parallel"),
            vmem_limit_bytes=_VMEM_LIMIT_BYTES),
    )(x2)
    return out.reshape(orig_shape)


def pooling_forward(x, pool_type, dim, nonlinearity=None,
                    in_tile_bytes=_IN_TILE_BYTES):
    """JAX/Pallas equivalent of Pooling(pool_type, dim, nonlinearity)(x)."""
    if pool_type not in _VALID_POOLS:
        raise ValueError(f"Invalid pool type {pool_type}.")
    if nonlinearity not in _NONLIN:
        raise ValueError(f"Invalid nonlinearity {nonlinearity}.")

    if pool_type is None:
        if nonlinearity is None:
            return x  # pure identity: skip the HBM round-trip entirely
        return _elementwise(x, nonlinearity)

    d = dim % x.ndim
    P = int(np.prod(x.shape[:d], dtype=np.int64)) if d > 0 else 1
    S = x.shape[d]
    D = int(np.prod(x.shape[d + 1:], dtype=np.int64)) if d < x.ndim - 1 else 1
    out_shape = x.shape[:d] + x.shape[d + 1:]

    if D == 1:
        out = _pool2d(x.reshape(P, S), pool_type, nonlinearity, in_tile_bytes)
    else:
        out = _pool3d(x.reshape(P, S, D), pool_type, nonlinearity, in_tile_bytes)
    return out.reshape(out_shape)


# ---------------------------------------------------------------------------
# Reference (plain JAX) for verification
# ---------------------------------------------------------------------------
def _ref_forward(x, pool_type, dim, nonlinearity):
    pools = {
        None: lambda t: t,
        "mean": lambda t: jnp.mean(t, axis=dim),
        "max": lambda t: jnp.max(t, axis=dim),
        "min": lambda t: jnp.min(t, axis=dim),
        "sum": lambda t: jnp.sum(t, axis=dim),
    }
    r = pools[pool_type](x)
    return _NONLIN[nonlinearity](r).astype(x.dtype)


if __name__ == "__main__":
    key = jax.random.PRNGKey(0)
    k1, k2, k3, k4 = jax.random.split(key, 4)
    # small shapes consistent with the module
    x3 = jax.random.normal(k1, (2, 16, 32), dtype=jnp.float32)      # (B, S, H)
    x4 = jax.random.normal(k2, (2, 4, 16, 16), dtype=jnp.float32)   # (B, C, H, W)
    # slightly longer pooled axes (+ a tiny forced tile budget) so the
    # in-kernel S-tail masking paths get exercised at small sizes
    x2 = jax.random.normal(k3, (16, 3000), dtype=jnp.float32)
    x5 = jax.random.normal(k4, (4, 600, 32), dtype=jnp.float32)

    cases = [
        # (x, pool_type, dim, nonlinearity, forced_in_tile_bytes or None)
        (x3, "mean", 1, "relu", None),
        (x3, "max", 1, None, None),
        (x3, "min", 1, "sigmoid", None),
        (x3, "sum", 1, "softplus", None),
        (x3, "sum", -1, "exp", None),       # D == 1 lane-dense path
        (x3, "max", 0, None, None),         # P == 1 path
        (x3, None, 1, "relu", None),        # elementwise path
        (x3, None, 1, None, None),          # identity shortcut
        (x4, "mean", 2, "relu", None),
        (x4, "max", -1, None, None),        # D == 1 lane-dense path, 4-D input
        # tiny tile budget -> multiple S tiles + in-kernel tail masking
        (x2, "max", -1, "relu", 64 << 10),  # 2-D path, masked tail
        (x2, "mean", -1, None, 64 << 10),   # 2-D path, masked tail, mean scale
        (x5, "sum", 1, None, 64 << 10),     # 3-D path, masked tail
        (x5, "min", 1, None, 64 << 10),     # 3-D path, masked tail
    ]

    ok = True
    for x, pool_type, dim, nonlin, tile_bytes in cases:
        kwargs = {} if tile_bytes is None else {"in_tile_bytes": tile_bytes}
        out = jax.block_until_ready(
            pooling_forward(x, pool_type, dim, nonlin, **kwargs))
        ref = _ref_forward(x, pool_type, dim, nonlin)
        if out.shape != ref.shape or not np.allclose(
            np.asarray(out), np.asarray(ref), atol=1e-4, rtol=1e-4
        ):
            ok = False
            print(f"MISMATCH for pool={pool_type}, dim={dim}, nonlin={nonlin}")

    if ok:
        print("KERNEL_OK")
</pallas_src>

<mosaic_0001>
module attributes {stable_mosaic.version = 11 : i64} {
  func.func @_pool3d_kernel(%arg0: i32, %arg1: i32, %arg2: i32, %arg3: memref<2x16x32xf32, #tpu.memory_space<vmem>>, %arg4: memref<2x32xf32, #tpu.memory_space<vmem>>, %arg5: memref<2x32xf32, #tpu.memory_space<vmem>>) attributes {dimension_semantics = [#tpu.dimension_semantics<parallel>, #tpu.dimension_semantics<parallel>, #tpu.dimension_semantics<arbitrary>], iteration_bounds = array<i64: 1, 1, 1>, scalar_prefetch = 0 : i64, scratch_operands = 1 : i64, tpu.core_type = #tpu.core_type<tc>, window_params = [{transform_indices = @transform_0, window_bounds = array<i64: 2, 16, 32>}, {transform_indices = @transform_1, window_bounds = array<i64: 2, 32>}]} {
    %c0_i32 = arith.constant 0 : i32
    %0 = arith.cmpi eq, %arg2, %c0_i32 : i32
    %1 = arith.extui %0 : i1 to i32
    %c0_i32_0 = arith.constant 0 : i32
    %2 = arith.cmpi ne, %1, %c0_i32_0 : i32
    scf.if %2 {
      %cst_9 = arith.constant 0.000000e+00 : f32
      %11 = vector.broadcast %cst_9 : f32 to vector<2x32xf32>
      %c0_10 = arith.constant 0 : index
      %c0_11 = arith.constant 0 : index
      %12 = vector.load %arg5[%c0_10, %c0_11] : memref<2x32xf32, #tpu.memory_space<vmem>>, vector<2x32xf32>
      tpu.vector_store %arg5[%c0_10, %c0_11], %11 {strides = array<i32>} : memref<2x32xf32, #tpu.memory_space<vmem>>, vector<2x32xf32>,
    } else {
    }
    %c0 = arith.constant 0 : index
    %c0_1 = arith.constant 0 : index
    %c0_2 = arith.constant 0 : index
    %3 = vector.load %arg3[%c0, %c0_1, %c0_2] : memref<2x16x32xf32, #tpu.memory_space<vmem>>, vector<2x16x32xf32>
    %c0_3 = arith.constant 0 : index
    %c0_4 = arith.constant 0 : index
    %4 = vector.load %arg5[%c0_3, %c0_4] : memref<2x32xf32, #tpu.memory_space<vmem>>, vector<2x32xf32>
    %cst = arith.constant dense<0.000000e+00> : vector<2x32xf32>
    %5 = vector.multi_reduction <add>, %3, %cst [1] : vector<2x16x32xf32> to vector<2x32xf32>
    %6 = arith.addf %4, %5 : vector<2x32xf32>
    %c0_5 = arith.constant 0 : index
    %c0_6 = arith.constant 0 : index
    %7 = vector.load %arg5[%c0_5, %c0_6] : memref<2x32xf32, #tpu.memory_space<vmem>>, vector<2x32xf32>
    tpu.vector_store %arg5[%c0_5, %c0_6], %6 {strides = array<i32>} : memref<2x32xf32, #tpu.memory_space<vmem>>, vector<2x32xf32>,
    %c0_i32_7 = arith.constant 0 : i32
    %8 = arith.cmpi eq, %arg2, %c0_i32_7 : i32
    %9 = arith.extui %8 : i1 to i32
    %c0_i32_8 = arith.constant 0 : i32
    %10 = arith.cmpi ne, %9, %c0_i32_8 : i32
    scf.if %10 {
      %c0_9 = arith.constant 0 : index
      %c0_10 = arith.constant 0 : index
      %11 = vector.load %arg5[%c0_9, %c0_10] : memref<2x32xf32, #tpu.memory_space<vmem>>, vector<2x32xf32>
      %cst_11 = arith.constant 6.250000e-02 : f32
      %12 = vector.broadcast %cst_11 : f32 to vector<2x32xf32>
      %13 = arith.mulf %11, %12 : vector<2x32xf32>
      %cst_12 = arith.constant 0.000000e+00 : f32
      %14 = vector.broadcast %cst_12 : f32 to vector<2x32xf32>
      %15 = arith.maximumf %13, %14 : vector<2x32xf32>
      %c0_13 = arith.constant 0 : index
      %c0_14 = arith.constant 0 : index
      %16 = vector.load %arg4[%c0_13, %c0_14] : memref<2x32xf32, #tpu.memory_space<vmem>>, vector<2x32xf32>
      tpu.vector_store %arg4[%c0_13, %c0_14], %15 {strides = array<i32>} : memref<2x32xf32, #tpu.memory_space<vmem>>, vector<2x32xf32>,
    } else {
    }
    return
  }
  func.func @transform_0(%arg0: i32, %arg1: i32, %arg2: i32) -> (i32, i32, i32) {
    %c0_i32 = arith.constant 0 : i32
    return %arg0, %arg2, %arg1 : i32, i32, i32
  }
  func.func @transform_1(%arg0: i32, %arg1: i32, %arg2: i32) -> (i32, i32) {
    %c0_i32 = arith.constant 0 : i32
    return %arg0, %arg1 : i32, i32
  }
}

</mosaic_0001>

<bundles_post_ra>
// kernel: tpu_custom_call.1
= control target key start
LH: loop header
LB: loop body
LE: loop exit
PB: predicated region body
PF: predicated region fallthrough
CT: control target
= control target key end

     0   :  { %6 = vsyncpa [#allocation4], 0  ;;  %s178_s0 = inlined_call_operand.hbm [shape: f32[2,16,32], index: 0, kind: input, shape index: {}]   ;;  %s179_s1 = inlined_call_operand.hbm [shape: f32[2,32], index: 1, kind: output, shape index: {}]  }
   0x1   :  { %7 = vsyncpa [#allocation5], 0  ;;  %s136_s6 = smov [#allocation3]   ;;  %s88_s10 = scalar_lea.hbm %s178_s0, 512 }
   0x2   :  { %s13_s7 = sshll.u32 %s136_s6, 4  ;;  %p89_p0 = scmp.ne.s32.totalorder %s178_s0, %s88_s10  ;;  %s14_s7 = int_to_ptr.vmem [resolvable:$true] %s13_s7 }
   0x3   :  { %p92_p1 = scmp.lt.u32.totalorder %s88_s10, %s178_s0 }
   0x5   :  { %p94_p2 = pnand %p92_p1, %p89_p0 }
   0x7   :  { %97 = shalt.err (!%p94_p2)
}
   0x8   :  { %s98_s15 = scalar_lea.vmem %s14_s7, 512  ;;  %p103_p4 = scmp.lt.s32.totalorder %s14_s7, %s14_s7 }
   0x9   :  { %p99_p3 = scmp.ne.s32.totalorder %s14_s7, %s98_s15  ;;  %p104_p5 = scmp.lt.s32.totalorder %s98_s15, %s98_s15 }
   0xb   :  { %p105_p6 = por %p104_p5, %p103_p4 }
   0xd   :  { %p106_p7 = pnand %p105_p6, %p99_p3 }
   0xf   :  { %109 = shalt.err (!%p106_p7)
}
  0x10   :  { %s137_s16 = smov 128   ;;  %s138_s17 = smov 8  }
  0x11   :  { %19 = dma.hbm_to_vmem [thread:$0]  %s178_s0, 512, %s14_s7, [#allocation4], %s137_s16, %s137_s16, %s138_s17  }
  0x12   :  { %132 = dma.done.wait [#allocation4], 512  }
  0x13   :  { %133 = vsyncadd [#allocation4], 4294966784  ;;  %vm27_vm0 = vcmask 254976   ;;  %v139_v0 = vmov 0.0   ;;  %vm34_vm1 = vcmask 261120   ;;  %v29_v1 = vld [vmem:[#allocation3] sm:$0xff] }
  0x14   :  { %28 = vst.msk [vmem:[#allocation2] sm:$0x3] %vm27_vm0, %v139_v0  ;;  %v30_v2 = vld [vmem:[#allocation3 + $0x8] sm:$0xff]  ;;  %v31_v3 = vld [vmem:[#allocation3 + $0x10] sm:$0xff]  ;;  %v32_v4 = vld [vmem:[#allocation3 + $0x18] sm:$0xff]  ;;  %v35_v5 = vsel %vm34_vm1, %v29_v1, 0.0 }
  0x15   :  { %v36_v6 = vsel %vm34_vm1, %v30_v2, 0.0  ;;  %v44_v7 = vsel %vm34_vm1, %v31_v3, 0.0  ;;  %v45_v9 = vsel %vm34_vm1, %v32_v4, 0.0  ;;  %vm55_vm2 = vcmask 1041409   ;;  %s140_s0 = smov [#allocation6]  }
  0x16   :  { %v37_v8 = vadd.f32 %v36_v6, %v35_v5  ;;  %v46_v10 = vadd.f32 %v45_v9, %v44_v7  ;;  %s74_s20 = sshll.u32 %s140_s0, 4  ;;  %s75_s20 = int_to_ptr.vmem [resolvable:$true] %s74_s20 }
  0x17   :  { %s110_s21 = scalar_lea.vmem %s75_s20, 32  ;;  %p115_p9 = scmp.lt.s32.totalorder %s75_s20, %s75_s20 }
  0x18   :  { %v38_v11 = vrot.slane %v37_v8, 4  ;;  %v47_v12 = vrot.slane %v46_v10, 4  ;;  %p111_p8 = scmp.ne.s32.totalorder %s75_s20, %s110_s21  ;;  %p116_p10 = scmp.lt.s32.totalorder %s110_s21, %s110_s21 }
  0x1a   :  { %v39_v13 = vadd.f32 %v38_v11, %v37_v8  ;;  %v48_v14 = vadd.f32 %v47_v12, %v46_v10  ;;  %p117_p11 = por %p116_p10, %p115_p9 }
  0x1b   :  { %v33_v22 = vld [vmem:[#allocation2] sm:$0x3] }
  0x1c   :  { %v40_v15 = vrot.slane %v39_v13, 2  ;;  %v49_v16 = vrot.slane %v48_v14, 2  ;;  %p118_p12 = pnand %p117_p11, %p111_p8 }
  0x1e   :  { %v41_v17 = vadd.f32 %v40_v15, %v39_v13  ;;  %v50_v18 = vadd.f32 %v49_v16, %v48_v14 }
  0x20   :  { %v42_v19 = vrot.slane %v41_v17, 1  ;;  %v51_v20 = vrot.slane %v50_v18, 1 }
  0x22   :  { %v43_v21 = vadd.f32 %v42_v19, %v41_v17  ;;  %v52_v23 = vadd.f32 %v51_v20, %v50_v18 }
  0x24   :  { %v56_v24 = vsel %vm55_vm2, %v52_v23, %v43_v21 }
  0x25   :  { %v58_v25 = vadd.f32 %v56_v24, %v33_v22 }
  0x27   :  { %60 = vst.msk [vmem:[#allocation2] sm:$0x3] %vm27_vm0, %v58_v25 }
  0x2e   :  { %v64_v26 = vld [vmem:[#allocation2] sm:$0x3] }
  0x2f   :  { %v65_v27 = vmul.f32 0.0625, %v64_v26 }
  0x31   :  { %v66_v28 = vmax.f32 %v65_v27, 0.0 }
  0x33   :  { %67 = vst.msk [vmem:[#allocation6] sm:$0x3] %vm27_vm0, %v66_v28 }
  0x34   :  { %121 = shalt.err (!%p118_p12)
}
  0x35   :  { %s122_s24 = scalar_lea.hbm %s179_s1, 32 }
  0x36   :  { %p123_p13 = scmp.ne.s32.totalorder %s179_s1, %s122_s24  ;;  %p126_p0 = scmp.lt.u32.totalorder %s122_s24, %s179_s1 }
  0x38   :  { %p128_p1 = pnand %p126_p0, %p123_p13 }
  0x3a   :  { %131 = shalt.err (!%p128_p1)
}
  0x3b   :  { %77 = dma.vmem_to_hbm [thread:$0]  %s75_s20, 32, %s179_s1, [#allocation5]  }
  0x3c   :  { %134 = dma.done.wait [#allocation5], 32  }
  0x3d   :  { %135 = vsyncadd [#allocation5], 4294967264 }
  0x3e   :  { %81 = vsyncpa [#allocation4], 1 }
  0x3f   :  { %82 = vsyncpa [#allocation5], 1 }

</bundles_post_ra>
